<compile_context>
chip_gen: v5e
topology: v5e:2x2
jax: 0.10.0
libtpu: 0.0.40
codegen_flags: <defaults>
</compile_context>

<pallas_src>
import math

import jax
import jax.numpy as jnp
from jax.experimental import pallas as pl
from jax.experimental.pallas import tpu as pltpu

_INV_SQRT2 = 1.0 / math.sqrt(2.0)


def _round_up(x: int, m: int) -> int:
    return ((x + m - 1) // m) * m


def _vilt_intermediate_kernel(x_ref, w_ref, b_ref, o_ref):
    # x_ref: (tm, H) compute_dtype   w_ref: (H, tn) compute_dtype
    # b_ref: (1, tn) float32         o_ref: (tm, tn) out_dtype
    acc = jnp.dot(x_ref[...], w_ref[...], preferred_element_type=jnp.float32)
    acc = acc + b_ref[...]  # bias is f32; stays in the f32 accumulator
    # Exact GELU (matches torch.nn.GELU() default, approximate='none'):
    #   gelu(x) = 0.5 * x * (1 + erf(x / sqrt(2)))
    gelu = 0.5 * acc * (1.0 + jax.lax.erf(acc * _INV_SQRT2))
    o_ref[...] = gelu.astype(o_ref.dtype)


def vilt_intermediate(hidden_states, weight, bias, *, tm=256,
                      compute_dtype=jnp.bfloat16,
                      vmem_budget_bytes=40 * (1 << 20)):
    """ViltIntermediate forward: GELU(hidden_states @ weight + bias).

    hidden_states: [..., H]; weight: [H, I] (= torch Linear weight.T); bias: [I].
    compute_dtype: dtype fed to the MXU (accumulation is always f32);
                   pass jnp.float32 (or None -> input dtype) to opt out of bf16.
    """
    orig_shape = hidden_states.shape
    H = orig_shape[-1]
    assert weight.shape[0] == H, "weight must be [hidden, intermediate] (torch W.T)"
    I = weight.shape[1]
    out_dtype = hidden_states.dtype
    if compute_dtype is None:
        compute_dtype = out_dtype

    x2d = hidden_states.reshape(-1, H)
    M = x2d.shape[0]

    itx = int(jnp.dtype(compute_dtype).itemsize)
    ito = int(jnp.dtype(out_dtype).itemsize)

    # Row tile: large by default, multiple of 16 sublanes (covers bf16/f32
    # minimum tiles), but never bigger than the (16-rounded) row count.
    tm = max(16, min(_round_up(tm, 16), _round_up(M, 16)))
    M_pad = _round_up(M, tm)

    # Column tile over the intermediate dim: keep the whole weight resident
    # when the double-buffered tiles fit the per-core VMEM budget (sized for
    # v7x's 64 MiB/core; v5e/v6e have 128 MiB); otherwise split N.
    def _vmem_estimate(tn_: int) -> int:
        return (2 * tm * H * itx       # x tiles (double buffered)
                + 2 * H * tn_ * itx    # weight tiles (double buffered)
                + 2 * tn_ * 4          # bias tiles (f32)
                + 2 * tm * tn_ * ito)  # output tiles (double buffered)

    tn = _round_up(I, 128)
    while _vmem_estimate(tn) > vmem_budget_bytes and tn > 512:
        tn = _round_up((tn + 1) // 2, 128)
    I_pad = _round_up(I, tn)
    n_tiles = I_pad // tn
    m_tiles = M_pad // tm

    # Pad operands to the tile grid (padded rows/cols are sliced off below).
    x_p = x2d if M_pad == M else jnp.pad(x2d, ((0, M_pad - M), (0, 0)))
    x_p = x_p.astype(compute_dtype)
    w_p = weight if I_pad == I else jnp.pad(weight, ((0, 0), (0, I_pad - I)))
    w_p = w_p.astype(compute_dtype)
    b_p = bias.astype(jnp.float32)
    if I_pad != I:
        b_p = jnp.pad(b_p, ((0, I_pad - I),))
    b_p = b_p.reshape(1, I_pad)

    cost = pl.CostEstimate(
        flops=2 * M * H * I,
        transcendentals=M * I,  # one erf per output element
        bytes_accessed=int(M * H * itx + H * I * itx + I * 4 + M * I * ito),
    )

    if n_tiles == 1:
        # Whole weight resident in VMEM; 1-D grid over row tiles (megacore
        # shards this "parallel" axis across TensorCores on v7x).
        grid = (m_tiles,)
        in_specs = [
            pl.BlockSpec((tm, H), lambda i: (i, 0)),    # activations tile
            pl.BlockSpec((H, tn), lambda i: (0, 0)),    # weight, constant index -> fetched once
            pl.BlockSpec((1, tn), lambda i: (0, 0)),    # bias row
        ]
        out_specs = pl.BlockSpec((tm, tn), lambda i: (i, 0))
        dims = ("parallel",)
    else:
        # Weight too large for the budget: tile the intermediate dim with the
        # N axis OUTER so each weight tile is DMA'd from HBM exactly once.
        grid = (n_tiles, m_tiles)
        in_specs = [
            pl.BlockSpec((tm, H), lambda j, i: (i, 0)),
            pl.BlockSpec((H, tn), lambda j, i: (0, j)),
            pl.BlockSpec((1, tn), lambda j, i: (0, j)),
        ]
        out_specs = pl.BlockSpec((tm, tn), lambda j, i: (i, j))
        dims = ("parallel", "parallel")

    out_p = pl.pallas_call(
        _vilt_intermediate_kernel,
        out_shape=jax.ShapeDtypeStruct((M_pad, I_pad), out_dtype),
        grid_spec=pltpu.PrefetchScalarGridSpec(
            num_scalar_prefetch=0,
            grid=grid,
            in_specs=in_specs,
            out_specs=out_specs,
        ),
        compiler_params=pltpu.CompilerParams(
            dimension_semantics=dims,
            vmem_limit_bytes=int(min(vmem_budget_bytes + (8 << 20), 112 << 20)),
        ),
        cost_estimate=cost,
    )(x_p, w_p, b_p)

    out2d = out_p[:M, :I]
    return out2d.reshape(*orig_shape[:-1], I)


if __name__ == "__main__":
    key = jax.random.PRNGKey(0)
    k_x, k_w, k_b, k_x2, k_w2, k_b2 = jax.random.split(key, 6)

    def reference(x, w, b):
        y = x @ w + b
        return 0.5 * y * (1.0 + jax.lax.erf(y / jnp.sqrt(2.0)))

    # Case 1: batch=2, seq=8, hidden=32, intermediate=128 (tile-aligned).
    batch, seq, hidden, inter = 2, 8, 32, 128
    x = jax.random.normal(k_x, (batch, seq, hidden), dtype=jnp.float32)
    # Deterministic synthetic Linear params, stored as [hidden, inter] = torch W.T
    w = jax.random.normal(k_w, (hidden, inter), dtype=jnp.float32) * 0.02
    b = jax.random.normal(k_b, (inter,), dtype=jnp.float32) * 0.02

    out_bf16 = jax.block_until_ready(vilt_intermediate(x, w, b))  # default bf16 MXU path
    out_f32 = jax.block_until_ready(
        vilt_intermediate(x, w, b, compute_dtype=jnp.float32))
    ref = reference(x, w, b)
    assert out_bf16.shape == (batch, seq, inter)
    assert jnp.allclose(out_f32, ref, atol=1e-5, rtol=1e-5)
    assert jnp.allclose(out_bf16, ref, atol=5e-3, rtol=5e-2)

    # Case 2: ragged shapes (exercise row + column padding): seq=13, inter=96.
    batch2, seq2, hidden2, inter2 = 2, 13, 32, 96
    x2 = jax.random.normal(k_x2, (batch2, seq2, hidden2), dtype=jnp.float32)
    w2 = jax.random.normal(k_w2, (hidden2, inter2), dtype=jnp.float32) * 0.02
    b2 = jax.random.normal(k_b2, (inter2,), dtype=jnp.float32) * 0.02
    out2 = jax.block_until_ready(
        vilt_intermediate(x2, w2, b2, compute_dtype=jnp.float32))
    ref2 = reference(x2, w2, b2)
    assert out2.shape == (batch2, seq2, inter2)
    assert jnp.allclose(out2, ref2, atol=1e-5, rtol=1e-5)

    print("KERNEL_OK")
</pallas_src>

<mosaic_0001>
module attributes {stable_mosaic.version = 11 : i64} {
  func.func @_vilt_intermediate_kernel(%arg0: i32, %arg1: memref<16x32xbf16, #tpu.memory_space<vmem>>, %arg2: memref<32x128xbf16, #tpu.memory_space<vmem>>, %arg3: memref<1x128xf32, #tpu.memory_space<vmem>>, %arg4: memref<16x128xf32, #tpu.memory_space<vmem>>) attributes {dimension_semantics = [#tpu.dimension_semantics<parallel>], iteration_bounds = array<i64: 1>, scalar_prefetch = 0 : i64, scratch_operands = 0 : i64, tpu.core_type = #tpu.core_type<tc>, window_params = [{transform_indices = @transform_0, window_bounds = array<i64: 16, 32>}, {pipeline_mode = #tpu.pipeline_mode<synchronous>, transform_indices = @transform_1, window_bounds = array<i64: 32, 128>}, {pipeline_mode = #tpu.pipeline_mode<synchronous>, transform_indices = @transform_2, window_bounds = array<i64: 1, 128>}, {transform_indices = @transform_3, window_bounds = array<i64: 16, 128>}]} {
    %c0 = arith.constant 0 : index
    %c0_0 = arith.constant 0 : index
    %0 = vector.load %arg1[%c0, %c0_0] : memref<16x32xbf16, #tpu.memory_space<vmem>>, vector<16x32xbf16>
    %c0_1 = arith.constant 0 : index
    %c0_2 = arith.constant 0 : index
    %1 = vector.load %arg2[%c0_1, %c0_2] : memref<32x128xbf16, #tpu.memory_space<vmem>>, vector<32x128xbf16>
    %cst = arith.constant dense<0.000000e+00> : vector<16x128xf32>
    %2 = tpu.matmul %0, %1, %cst {dimension_numbers = #tpu.dot_dimension_numbers<[1], [0], [0], [1], [0, 0, 1, 1], [], []>} : vector<16x32xbf16>, vector<32x128xbf16>, vector<16x128xf32> -> vector<16x128xf32>
    %c0_3 = arith.constant 0 : index
    %c0_4 = arith.constant 0 : index
    %3 = vector.load %arg3[%c0_3, %c0_4] : memref<1x128xf32, #tpu.memory_space<vmem>>, vector<1x128xf32>
    %4 = vector.broadcast %3 : vector<1x128xf32> to vector<16x128xf32>
    %5 = arith.addf %2, %4 : vector<16x128xf32>
    %cst_5 = arith.constant 5.000000e-01 : f32
    %6 = vector.broadcast %cst_5 : f32 to vector<16x128xf32>
    %7 = arith.mulf %6, %5 : vector<16x128xf32>
    %cst_6 = arith.constant 0.707106769 : f32
    %8 = vector.broadcast %cst_6 : f32 to vector<16x128xf32>
    %9 = arith.mulf %5, %8 : vector<16x128xf32>
    %10 = math.erf %9 : vector<16x128xf32>
    %cst_7 = arith.constant 1.000000e+00 : f32
    %11 = vector.broadcast %cst_7 : f32 to vector<16x128xf32>
    %12 = arith.addf %11, %10 : vector<16x128xf32>
    %13 = arith.mulf %7, %12 : vector<16x128xf32>
    %c0_8 = arith.constant 0 : index
    %c0_9 = arith.constant 0 : index
    %14 = vector.load %arg4[%c0_8, %c0_9] : memref<16x128xf32, #tpu.memory_space<vmem>>, vector<16x128xf32>
    tpu.vector_store %arg4[%c0_8, %c0_9], %13 {strides = array<i32>} : memref<16x128xf32, #tpu.memory_space<vmem>>, vector<16x128xf32>,
    return
  }
  func.func @transform_0(%arg0: i32) -> (i32, i32) {
    %c0_i32 = arith.constant 0 : i32
    %c0_i32_0 = arith.constant 0 : i32
    return %arg0, %c0_i32 : i32, i32
  }
  func.func @transform_1(%arg0: i32) -> (i32, i32) {
    %c0_i32 = arith.constant 0 : i32
    %c0_i32_0 = arith.constant 0 : i32
    %c0_i32_1 = arith.constant 0 : i32
    return %c0_i32, %c0_i32_0 : i32, i32
  }
  func.func @transform_2(%arg0: i32) -> (i32, i32) {
    %c0_i32 = arith.constant 0 : i32
    %c0_i32_0 = arith.constant 0 : i32
    %c0_i32_1 = arith.constant 0 : i32
    return %c0_i32, %c0_i32_0 : i32, i32
  }
  func.func @transform_3(%arg0: i32) -> (i32, i32) {
    %c0_i32 = arith.constant 0 : i32
    %c0_i32_0 = arith.constant 0 : i32
    return %arg0, %c0_i32 : i32, i32
  }
}

</mosaic_0001>

<bundles_post_ra>
// kernel: tpu_custom_call.1
= control target key start
LH: loop header
LB: loop body
LE: loop exit
PB: predicated region body
PF: predicated region fallthrough
CT: control target
= control target key end

     0   :  { %8 = vsyncpa [#allocation3], 0  ;;  %s363_s0 = inlined_call_operand.hbm [shape: bf16[16,32], index: 0, kind: input, shape index: {}]   ;;  %s364_s1 = inlined_call_operand.hbm [shape: bf16[32,128], index: 1, kind: input, shape index: {}]   ;;  %s365_s2 = inlined_call_operand.vmem [shape: f32[1,128], index: 2, kind: input, shape index: {}]   ;;  %s366_s3 = inlined_call_operand.hbm [shape: f32[16,128], index: 3, kind: output, shape index: {}]  }
   0x1   :  { %9 = vsyncpa [#allocation6], 0 }
   0x2   :  { %10 = vsyncpa [#allocation4], 0  ;;  %s15_s14 = sshll.u32 %s363_s0, 4  ;;  %s311_s15 = smov [#allocation2]   ;;  %s16_s14 = int_to_ptr.hbm [resolvable:$true] %s15_s14 }
   0x3   :  { %s17_s16 = sshll.u32 %s311_s15, 4  ;;  %s28_s19 = sshll.u32 %s364_s1, 4  ;;  %s18_s16 = int_to_ptr.vmem [resolvable:$true] %s17_s16  ;;  %s29_s19 = int_to_ptr.hbm [resolvable:$true] %s28_s19 }
   0x4   :  { %s312_s20 = smov 64   ;;  %s313_s21 = smov 4  }
   0x5   :  { %23 = dma.hbm_to_vmem [thread:$0]  %s16_s14, 128, %s18_s16, [#allocation3], %s312_s20, %s312_s20, %s313_s21  }
   0x6   :  { %s314_s22 = smov [#allocation5]  }
   0x7   :  { %s30_s23 = sshll.u32 %s314_s22, 4  ;;  %s31_s23 = int_to_ptr.vmem [resolvable:$true] %s30_s23 }
   0x8   :  { %36 = dma.hbm_to_vmem [thread:$0]  %s29_s19, 256, %s31_s23, [#allocation6], %s312_s20, %s312_s20, %s313_s21  }
   0x9   :  { %305 = dma.done.wait [#allocation3], 128  }
   0xa   :  { %306 = vsyncadd [#allocation3], 4294967168 }
   0xb   :  { %307 = dma.done.wait [#allocation6], 256  }
   0xc   :  { %308 = vsyncadd [#allocation6], 4294967040  ;;  %v220_v0 = vld [vmem:[#allocation5 + $0x8] sm:$0xff]  ;;  %v219_v1 = vld [vmem:[#allocation5] sm:$0xff]  ;;  %vm75_vm0 = vcmask 261120   ;;  %s189_s27 = sshll.u32 %s366_s3, 4  ;;  %s190_s27 = int_to_ptr.hbm [resolvable:$true] %s189_s27 }
   0xd   :  { %85 = vmatpush.bf16.msra.mxu0 %v220_v0  ;;  %v218_v2 = vld [vmem:[#allocation2] sm:$0xff]  ;;  %s316_s28 = smov 128   ;;  %s317_s29 = smov 8  }
   0xe   :  { %v228_v3 = vld [vmem:[%s365_s2] ss:$0 sm:$0xff]  ;;  %s315_s2 = smov [#allocation7]  }
   0xf   :  { %s187_s24 = sshll.u32 %s315_s2, 4  ;;  %s188_s24 = int_to_ptr.vmem [resolvable:$true] %s187_s24 }
  0x11   :  { %86 = vmatpush.bf16.msra.mxu0 %v219_v1 }
  0x14   :  { %215 = vmatmul.msk.bf16.vlgmr.msra.gmra.mxu0 %vm75_vm0, %v218_v2 }
  0x91   :  { %v88_v4 = vpop.f32.mrf.mxu0 }
  0x92   :  { %v347_v5 = vadd.f32 %v228_v3, %v88_v4 }
  0x94   :  { %v95_v6 = vmul.f32 0.70710677, %v347_v5 }
  0x96   :  { %v97_v7 = vmul.f32 %v95_v6, %v95_v6 }
  0x98   :  { %v98_v8 = vmin.f32 %v97_v7, 16.0 }
  0x99   :  { %v90_v9 = vpop.f32.mrf.mxu0 }
  0x9a   :  { %v99_v10 = vmul.f32 2.1237322e-06, %v98_v8  ;;  %v110_v11 = vmul.f32 3.8918573e-05, %v98_v8  ;;  %v350_v12 = vadd.f32 %v228_v3, %v90_v9 }
  0x9c   :  { %v100_v13 = vadd.f32 0.00028619796, %v99_v10  ;;  %v111_v14 = vadd.f32 0.001143296, %v110_v11  ;;  %v353_v15 = vmul.f32 0.70710677, %v350_v12 }
  0x9d   :  { %v93_v11 = vmul.f32 0.5, %v347_v5  ;;  %v94_v5 = vmul.f32 0.5, %v350_v12 }
  0x9e   :  { %v101_v16 = vmul.f32 %v100_v13, %v98_v8  ;;  %v112_v17 = vmul.f32 %v111_v14, %v98_v8  ;;  %v137_v18 = vmul.f32 %v353_v15, %v353_v15 }
  0xa0   :  { %v113_v19 = vadd.f32 0.014752088, %v112_v17  ;;  %v102_v20 = vadd.f32 0.0036580483, %v101_v16  ;;  %v138_v21 = vmin.f32 %v137_v18, 16.0 }
  0xa2   :  { %v114_v22 = vmul.f32 %v113_v19, %v98_v8  ;;  %v139_v23 = vmul.f32 2.1237322e-06, %v138_v21  ;;  %v150_v24 = vmul.f32 3.8918573e-05, %v138_v21  ;;  %v103_v26 = vmul.f32 %v102_v20, %v98_v8 }
  0xa4   :  { %v115_v25 = vadd.f32 0.112945676, %v114_v22  ;;  %v140_v27 = vadd.f32 0.00028619796, %v139_v23  ;;  %v151_v28 = vadd.f32 0.001143296, %v150_v24 }
  0xa5   :  { %v104_v33 = vadd.f32 0.05243302, %v103_v26 }
  0xa6   :  { %v116_v29 = vmul.f32 %v115_v25, %v98_v8  ;;  %v141_v30 = vmul.f32 %v140_v27, %v138_v21  ;;  %v152_v31 = vmul.f32 %v151_v28, %v138_v21 }
  0xa7   :  { %v105_v39 = vmul.f32 %v104_v33, %v98_v8 }
  0xa8   :  { %v117_v32 = vadd.f32 0.4994258, %v116_v29  ;;  %v153_v34 = vadd.f32 0.014752088, %v152_v31  ;;  %v142_v36 = vadd.f32 0.0036580483, %v141_v30 }
  0xa9   :  { %v106_v43 = vadd.f32 0.18741608, %v105_v39 }
  0xaa   :  { %v118_v35 = vmul.f32 %v117_v32, %v98_v8  ;;  %v154_v37 = vmul.f32 %v153_v34, %v138_v21  ;;  %v143_v41 = vmul.f32 %v142_v36, %v138_v21 }
  0xab   :  { %v107_v48 = vmul.f32 %v106_v43, %v98_v8 }
  0xac   :  { %v119_v38 = vadd.f32 1.0, %v118_v35  ;;  %v155_v40 = vadd.f32 0.112945676, %v154_v37  ;;  %v144_v45 = vadd.f32 0.05243302, %v143_v41 }
  0xad   :  { %v108_v54 = vadd.f32 1.1283791, %v107_v48 }
  0xae   :  { %229 = vrcp.f32 %v119_v38  ;;  %v156_v42 = vmul.f32 %v155_v40, %v138_v21  ;;  %v145_v51 = vmul.f32 %v144_v45, %v138_v21  ;;  %v131_v53 = vand.u32 2147483648, %v119_v38 }
  0xaf   :  { %v129_v56 = vand.u32 2147483647, %v119_v38  ;;  %vm125_vm2 = vweird.f32 %v119_v38  ;;  %v109_v61 = vmul.f32 %v108_v54, %v95_v6 }
  0xb0   :  { %v157_v44 = vadd.f32 0.4994258, %v156_v42  ;;  %v146_v57 = vadd.f32 0.18741608, %v145_v51  ;;  %v132_v59 = vor.u32 1.1754944e-38, %v131_v53 }
  0xb1   :  { %vm130_vm4 = vcmp.eq.f32.partialorder %v129_v56, 8.507059e+37 }
  0xb2   :  { %v158_v46 = vmul.f32 %v157_v44, %v138_v21  ;;  %v147_v0 = vmul.f32 %v146_v57, %v138_v21 }
  0xb4   :  { %v230_v47 = vpop.eup %229  ;;  %v159_v50 = vadd.f32 1.0, %v158_v46  ;;  %v148_v8 = vadd.f32 1.1283791, %v147_v0 }
  0xb5   :  { %v121_v49 = vmul.f32 %v230_v47, %v119_v38  ;;  %vm126_vm1 = vweird.f32 %v230_v47 }
  0xb6   :  { %231 = vrcp.f32 %v159_v50  ;;  %vm127_vm3 = vmor %vm125_vm2, %vm126_vm1  ;;  %v171_v7 = vand.u32 2147483648, %v159_v50  ;;  %v169_v10 = vand.u32 2147483647, %v159_v50  ;;  %vm165_vm6 = vweird.f32 %v159_v50 }
  0xb7   :  { %v122_v52 = vsub.f32 1.0, %v121_v49  ;;  %v149_v17 = vmul.f32 %v148_v8, %v353_v15 }
  0xb8   :  { %v172_v6 = vor.u32 1.1754944e-38, %v171_v7  ;;  %vm170_vm8 = vcmp.eq.f32.partialorder %v169_v10, 8.507059e+37 }
  0xb9   :  { %v123_v55 = vmul.f32 %v230_v47, %v122_v52 }
  0xbb   :  { %v124_v58 = vadd.f32 %v230_v47, %v123_v55 }
  0xbc   :  { %v232_v60 = vpop.eup %231 }
  0xbd   :  { %v128_v62 = vsel %vm127_vm3, %v230_v47, %v124_v58  ;;  %v161_v1 = vmul.f32 %v232_v60, %v159_v50  ;;  %vm166_vm5 = vweird.f32 %v232_v60 }
  0xbe   :  { %v133_v63 = vsel %vm130_vm4, %v132_v59, %v128_v62  ;;  %vm167_vm7 = vmor %vm165_vm6, %vm166_vm5 }
  0xbf   :  { %v134_v2 = vmul.f32 %v133_v63, %v109_v61  ;;  %v162_v3 = vsub.f32 1.0, %v161_v1 }
  0xc1   :  { %v216_v4 = vclamps-f32 %v134_v2, 1.0  ;;  %v163_v9 = vmul.f32 %v232_v60, %v162_v3 }
  0xc3   :  { %v177_v13 = vadd.f32 1.0, %v216_v4  ;;  %v164_v14 = vadd.f32 %v232_v60, %v163_v9 }
  0xc5   :  { %v179_v16 = vmul.f32 %v177_v13, %v93_v11  ;;  %v168_v18 = vsel %vm167_vm7, %v232_v60, %v164_v14 }
  0xc6   :  { %v173_v19 = vsel %vm170_vm8, %v172_v6, %v168_v18 }
  0xc7   :  { %181 = vst [vmem:[#allocation7] sm:$0xff] %v179_v16  ;;  %v174_v20 = vmul.f32 %v173_v19, %v149_v17 }
  0xc9   :  { %v217_v21 = vclamps-f32 %v174_v20, 1.0 }
  0xcb   :  { %v178_v22 = vadd.f32 1.0, %v217_v21 }
  0xcd   :  { %v180_v23 = vmul.f32 %v178_v22, %v94_v5 }
  0xcf   :  { %182 = vst [vmem:[#allocation7 + $0x8] sm:$0xff] %v180_v23 }
  0xd0   :  { %195 = dma.vmem_to_hbm [thread:$0]  %s188_s24, 256, %s190_s27, [#allocation4], %s316_s28, %s316_s28, %s317_s29  }
  0xd1   :  { %309 = dma.done.wait [#allocation4], 256  }
  0xd2   :  { %310 = vsyncadd [#allocation4], 4294967040 }
  0xd3   :  { %200 = vsyncpa [#allocation3], 1 }
  0xd4   :  { %201 = vsyncpa [#allocation6], 1 }
  0xd5   :  { %202 = vsyncpa [#allocation4], 1 }

</bundles_post_ra>
